<compile_context>
chip_gen: v6e
topology: v6e:2x2x1
jax: 0.10.0
libtpu: 0.0.40
codegen_flags: <defaults>
</compile_context>

<pallas_src>
import functools

import jax
import jax.numpy as jnp
import numpy as np
from jax import lax
from jax.experimental import pallas as pl
from jax.experimental.pallas import tpu as pltpu


_TAPS = tuple((oy, ox) for oy in (-1, 0, 1) for ox in (-1, 0, 1))


def _tap_masks_np(H, W):
    """(9, 1, H*W) 0/1 masks: mask[t, 0, y*W+x] == 1 iff (y+oy, x+ox) is in-image."""
    HW = H * W
    ys, xs = np.divmod(np.arange(HW), W)
    masks = np.empty((9, 1, HW), np.float32)
    for t, (oy, ox) in enumerate(_TAPS):
        ok = (ys + oy >= 0) & (ys + oy < H) & (xs + ox >= 0) & (xs + ox < W)
        masks[t, 0, :] = ok.astype(np.float32)
    return masks


def _residual_block_kernel(x_ref, w1_ref, b1_ref, w2_ref, b2_ref, m_ref,
                           out_ref, xx_ref, taps_ref, *, H, W, C, compute_dtype):
    # x_ref    : (1, C, H*W)   one image; channels on sublanes, spatial on lanes
    # w1_ref   : (C, 9*C)      conv1 weights, K-fused: [cout, (dy*3+dx)*C + cin]
    # b1_ref   : (C, 1)
    # w2_ref   : (C, 9*C)      conv2 weights
    # b2_ref   : (C, 1)
    # m_ref    : (9, 1, H*W)   precomputed 0/1 boundary masks per tap
    # out_ref  : (1, C, H*W)
    # xx_ref   : VMEM (C, 2*H*W)  lane-doubled staging buffer (rotation trick)
    # taps_ref : VMEM (9*C, H*W)  fused im2col matrix, rebuilt for each conv
    HW = H * W

    def stage_taps(src):
        # Duplicate `src` along lanes so every tap shift (-W-1 .. W+1) becomes a
        # single *static* lane slice (an exact rotation); out-of-image positions
        # are zeroed with the precomputed masks.  No padded copy, no halo
        # zero-fill, no offset-1 sublane stores.
        xx_ref[:, :HW] = src
        xx_ref[:, HW:] = src
        xx = xx_ref[...]                              # (C, 2*H*W)
        for t, (oy, ox) in enumerate(_TAPS):
            s = (oy * W + ox) % HW
            piece = xx[:, s:s + HW]                   # (C, H*W) == src rolled
            if not (oy == 0 and ox == 0):
                piece = piece * m_ref[t]              # (1, H*W) boundary mask
            taps_ref[t * C:(t + 1) * C, :] = piece

    xf = x_ref[0]                                     # (C, H*W), also the residual

    # conv1: one fused matmul, K = 9*C, N = H*W (lane dense), f32 accumulation.
    stage_taps(xf)
    h = jnp.dot(w1_ref[...].astype(compute_dtype),
                taps_ref[...].astype(compute_dtype),
                preferred_element_type=jnp.float32)   # (C, H*W)
    h = jnp.maximum(h + b1_ref[...], 0.0)             # bias + ReLU

    # conv2
    stage_taps(h)
    o = jnp.dot(w2_ref[...].astype(compute_dtype),
                taps_ref[...].astype(compute_dtype),
                preferred_element_type=jnp.float32)   # (C, H*W)
    o = o + b2_ref[...]

    # residual add + final ReLU; unmasked lane-dense store.
    out_ref[0] = jnp.maximum(o + xf, 0.0).astype(out_ref.dtype)


def residual_block(x_nchw, w1, b1, w2, b2, *, compute_dtype=jnp.float32):
    """RIDNet ResidualBlock forward.

    x_nchw : (B, C, H, W) float32
    w1, w2 : (3, 3, Cin, Cout) HWIO, Cin == Cout
    b1, b2 : (Cout,)
    compute_dtype: jnp.float32 (exact) or jnp.bfloat16 (fast MXU path on
        v6e/v7x; accumulation stays float32).
    Returns (B, C, H, W) float32.
    """
    B, C, H, W = x_nchw.shape
    assert w1.shape == (3, 3, C, C) and w2.shape == (3, 3, C, C), \
        "residual add requires in_channels == out_channels"
    HW = H * W

    # Layout plumbing only (free reshape of the activation; tiny one-off weight
    # transposes) -- no extra full-size HBM copy and no jnp.pad.
    x_flat = x_nchw.reshape(B, C, HW).astype(jnp.float32)
    w1_all = jnp.transpose(w1, (3, 0, 1, 2)).reshape(C, 9 * C).astype(jnp.float32)
    w2_all = jnp.transpose(w2, (3, 0, 1, 2)).reshape(C, 9 * C).astype(jnp.float32)
    b1c = b1.reshape(C, 1).astype(jnp.float32)
    b2c = b2.reshape(C, 1).astype(jnp.float32)
    masks = jnp.asarray(_tap_masks_np(H, W))

    kernel = functools.partial(_residual_block_kernel, H=H, W=W, C=C,
                               compute_dtype=compute_dtype)

    # Grid: one image per step, batch axis "parallel" (keeps both v7x
    # TensorCores busy for B >= 2).  For realistic RIDNet sizes, add an H-strip
    # grid axis with a 1-row halo index_map so blocks stay within v7x's 64 MiB
    # VMEM; at 16x16x4 a whole image is far below the limit.
    out_flat = pl.pallas_call(
        kernel,
        out_shape=jax.ShapeDtypeStruct((B, C, HW), jnp.float32),
        grid_spec=pltpu.PrefetchScalarGridSpec(
            num_scalar_prefetch=0,
            grid=(B,),
            in_specs=[
                pl.BlockSpec((1, C, HW), lambda b: (b, 0, 0)),
                pl.BlockSpec((C, 9 * C), lambda b: (0, 0)),
                pl.BlockSpec((C, 1), lambda b: (0, 0)),
                pl.BlockSpec((C, 9 * C), lambda b: (0, 0)),
                pl.BlockSpec((C, 1), lambda b: (0, 0)),
                pl.BlockSpec((9, 1, HW), lambda b: (0, 0, 0)),
            ],
            out_specs=pl.BlockSpec((1, C, HW), lambda b: (b, 0, 0)),
            scratch_shapes=[
                pltpu.VMEM((C, 2 * HW), jnp.float32),   # lane-doubled staging
                pltpu.VMEM((9 * C, HW), jnp.float32),   # fused im2col taps
            ],
        ),
        compiler_params=pltpu.CompilerParams(
            dimension_semantics=("parallel",),
            vmem_limit_bytes=32 * 1024 * 1024,
        ),
    )(x_flat, w1_all, b1c, w2_all, b2c, masks)

    return out_flat.reshape(B, C, H, W)


def _reference(x_nchw, w1, b1, w2, b2):
    """Pure-JAX reference (matches PyTorch Conv2d semantics)."""
    dn = ("NCHW", "HWIO", "NCHW")
    h = lax.conv_general_dilated(x_nchw, w1, (1, 1), "SAME", dimension_numbers=dn)
    h = jnp.maximum(h + b1[None, :, None, None], 0.0)
    o = lax.conv_general_dilated(h, w2, (1, 1), "SAME", dimension_numbers=dn)
    o = o + b2[None, :, None, None]
    return jnp.maximum(o + x_nchw, 0.0)


if __name__ == "__main__":
    B, C, H, W = 2, 4, 16, 16  # in_channels == out_channels == 4

    key = jax.random.PRNGKey(0)
    kx, k1, k2, k3, k4 = jax.random.split(key, 5)

    x = jax.random.normal(kx, (B, C, H, W), dtype=jnp.float32)

    # Deterministic synthetic parameters (PyTorch-default-like scale).
    fan_in = C * 3 * 3
    bound = 1.0 / np.sqrt(fan_in)
    w1 = jax.random.uniform(k1, (3, 3, C, C), jnp.float32, -bound, bound)
    b1 = jax.random.uniform(k2, (C,), jnp.float32, -bound, bound)
    w2 = jax.random.uniform(k3, (3, 3, C, C), jnp.float32, -bound, bound)
    b2 = jax.random.uniform(k4, (C,), jnp.float32, -bound, bound)

    ref = jax.block_until_ready(_reference(x, w1, b1, w2, b2))

    # f32 (exact) path.
    out = jax.block_until_ready(residual_block(x, w1, b1, w2, b2))
    np.testing.assert_allclose(np.asarray(out), np.asarray(ref), rtol=1e-5, atol=1e-5)

    # bf16-MXU-input path (v6e/v7x fast path; f32 accumulation), looser tolerance.
    out_bf16 = jax.block_until_ready(
        residual_block(x, w1, b1, w2, b2, compute_dtype=jnp.bfloat16))
    np.testing.assert_allclose(np.asarray(out_bf16), np.asarray(ref),
                               rtol=1e-1, atol=1e-1)

    print("KERNEL_OK")
</pallas_src>

<mosaic_0001>
module attributes {stable_mosaic.version = 11 : i64} {
  func.func @_residual_block_kernel(%arg0: i32, %arg1: memref<1x4x256xf32, #tpu.memory_space<vmem>>, %arg2: memref<4x36xf32, #tpu.memory_space<vmem>>, %arg3: memref<4x1xf32, #tpu.memory_space<vmem>>, %arg4: memref<4x36xf32, #tpu.memory_space<vmem>>, %arg5: memref<4x1xf32, #tpu.memory_space<vmem>>, %arg6: memref<9x1x256xf32, #tpu.memory_space<vmem>>, %arg7: memref<1x4x256xf32, #tpu.memory_space<vmem>>, %arg8: memref<4x512xf32, #tpu.memory_space<vmem>>, %arg9: memref<36x256xf32, #tpu.memory_space<vmem>>) attributes {dimension_semantics = [#tpu.dimension_semantics<parallel>], iteration_bounds = array<i64: 2>, scalar_prefetch = 0 : i64, scratch_operands = 2 : i64, tpu.core_type = #tpu.core_type<tc>, window_params = [{transform_indices = @transform_0, window_bounds = array<i64: 1, 4, 256>}, {pipeline_mode = #tpu.pipeline_mode<synchronous>, transform_indices = @transform_1, window_bounds = array<i64: 4, 36>}, {pipeline_mode = #tpu.pipeline_mode<synchronous>, transform_indices = @transform_2, window_bounds = array<i64: 4, 1>}, {pipeline_mode = #tpu.pipeline_mode<synchronous>, transform_indices = @transform_3, window_bounds = array<i64: 4, 36>}, {pipeline_mode = #tpu.pipeline_mode<synchronous>, transform_indices = @transform_4, window_bounds = array<i64: 4, 1>}, {pipeline_mode = #tpu.pipeline_mode<synchronous>, transform_indices = @transform_5, window_bounds = array<i64: 9, 1, 256>}, {transform_indices = @transform_6, window_bounds = array<i64: 1, 4, 256>}]} {
    %c0 = arith.constant 0 : index
    %c0_0 = arith.constant 0 : index
    %c0_1 = arith.constant 0 : index
    %0 = vector.load %arg1[%c0, %c0_0, %c0_1] : memref<1x4x256xf32, #tpu.memory_space<vmem>>, vector<1x4x256xf32>
    %1 = vector.shape_cast %0 : vector<1x4x256xf32> to vector<4x256xf32>
    %c0_2 = arith.constant 0 : index
    %c0_3 = arith.constant 0 : index
    %2 = vector.load %arg8[%c0_2, %c0_3] : memref<4x512xf32, #tpu.memory_space<vmem>>, vector<4x256xf32>
    tpu.vector_store %arg8[%c0_2, %c0_3], %1 {strides = array<i32>} : memref<4x512xf32, #tpu.memory_space<vmem>>, vector<4x256xf32>,
    %c0_4 = arith.constant 0 : index
    %c256 = arith.constant 256 : index
    %3 = vector.load %arg8[%c0_4, %c256] : memref<4x512xf32, #tpu.memory_space<vmem>>, vector<4x256xf32>
    tpu.vector_store %arg8[%c0_4, %c256], %1 {strides = array<i32>} : memref<4x512xf32, #tpu.memory_space<vmem>>, vector<4x256xf32>,
    %c0_5 = arith.constant 0 : index
    %c0_6 = arith.constant 0 : index
    %4 = vector.load %arg8[%c0_5, %c0_6] : memref<4x512xf32, #tpu.memory_space<vmem>>, vector<4x512xf32>
    %5 = vector.extract_strided_slice %4 {offsets = [0, 239], sizes = [4, 256], strides = [1, 1]} : vector<4x512xf32> to vector<4x256xf32>
    %c0_7 = arith.constant 0 : index
    %c0_8 = arith.constant 0 : index
    %c0_9 = arith.constant 0 : index
    %6 = vector.load %arg6[%c0_7, %c0_8, %c0_9] : memref<9x1x256xf32, #tpu.memory_space<vmem>>, vector<1x1x256xf32>
    %7 = vector.shape_cast %6 : vector<1x1x256xf32> to vector<1x256xf32>
    %8 = vector.broadcast %7 : vector<1x256xf32> to vector<4x256xf32>
    %9 = arith.mulf %5, %8 : vector<4x256xf32>
    %c0_10 = arith.constant 0 : index
    %c0_11 = arith.constant 0 : index
    %10 = vector.load %arg9[%c0_10, %c0_11] : memref<36x256xf32, #tpu.memory_space<vmem>>, vector<4x256xf32>
    tpu.vector_store %arg9[%c0_10, %c0_11], %9 {strides = array<i32>} : memref<36x256xf32, #tpu.memory_space<vmem>>, vector<4x256xf32>,
    %11 = vector.extract_strided_slice %4 {offsets = [0, 240], sizes = [4, 256], strides = [1, 1]} : vector<4x512xf32> to vector<4x256xf32>
    %c1 = arith.constant 1 : index
    %c0_12 = arith.constant 0 : index
    %c0_13 = arith.constant 0 : index
    %12 = vector.load %arg6[%c1, %c0_12, %c0_13] : memref<9x1x256xf32, #tpu.memory_space<vmem>>, vector<1x1x256xf32>
    %13 = vector.shape_cast %12 : vector<1x1x256xf32> to vector<1x256xf32>
    %14 = vector.broadcast %13 : vector<1x256xf32> to vector<4x256xf32>
    %15 = arith.mulf %11, %14 : vector<4x256xf32>
    %c4 = arith.constant 4 : index
    %c0_14 = arith.constant 0 : index
    %16 = vector.load %arg9[%c4, %c0_14] : memref<36x256xf32, #tpu.memory_space<vmem>>, vector<4x256xf32>
    tpu.vector_store %arg9[%c4, %c0_14], %15 {strides = array<i32>} : memref<36x256xf32, #tpu.memory_space<vmem>>, vector<4x256xf32>,
    %17 = vector.extract_strided_slice %4 {offsets = [0, 241], sizes = [4, 256], strides = [1, 1]} : vector<4x512xf32> to vector<4x256xf32>
    %c2 = arith.constant 2 : index
    %c0_15 = arith.constant 0 : index
    %c0_16 = arith.constant 0 : index
    %18 = vector.load %arg6[%c2, %c0_15, %c0_16] : memref<9x1x256xf32, #tpu.memory_space<vmem>>, vector<1x1x256xf32>
    %19 = vector.shape_cast %18 : vector<1x1x256xf32> to vector<1x256xf32>
    %20 = vector.broadcast %19 : vector<1x256xf32> to vector<4x256xf32>
    %21 = arith.mulf %17, %20 : vector<4x256xf32>
    %c8 = arith.constant 8 : index
    %c0_17 = arith.constant 0 : index
    %22 = vector.load %arg9[%c8, %c0_17] : memref<36x256xf32, #tpu.memory_space<vmem>>, vector<4x256xf32>
    tpu.vector_store %arg9[%c8, %c0_17], %21 {strides = array<i32>} : memref<36x256xf32, #tpu.memory_space<vmem>>, vector<4x256xf32>,
    %23 = vector.extract_strided_slice %4 {offsets = [0, 255], sizes = [4, 256], strides = [1, 1]} : vector<4x512xf32> to vector<4x256xf32>
    %c3 = arith.constant 3 : index
    %c0_18 = arith.constant 0 : index
    %c0_19 = arith.constant 0 : index
    %24 = vector.load %arg6[%c3, %c0_18, %c0_19] : memref<9x1x256xf32, #tpu.memory_space<vmem>>, vector<1x1x256xf32>
    %25 = vector.shape_cast %24 : vector<1x1x256xf32> to vector<1x256xf32>
    %26 = vector.broadcast %25 : vector<1x256xf32> to vector<4x256xf32>
    %27 = arith.mulf %23, %26 : vector<4x256xf32>
    %c12 = arith.constant 12 : index
    %c0_20 = arith.constant 0 : index
    %28 = vector.load %arg9[%c12, %c0_20] : memref<36x256xf32, #tpu.memory_space<vmem>>, vector<4x256xf32>
    tpu.vector_store %arg9[%c12, %c0_20], %27 {strides = array<i32>} : memref<36x256xf32, #tpu.memory_space<vmem>>, vector<4x256xf32>,
    %29 = vector.extract_strided_slice %4 {offsets = [0, 0], sizes = [4, 256], strides = [1, 1]} : vector<4x512xf32> to vector<4x256xf32>
    %c16 = arith.constant 16 : index
    %c0_21 = arith.constant 0 : index
    %30 = vector.load %arg9[%c16, %c0_21] : memref<36x256xf32, #tpu.memory_space<vmem>>, vector<4x256xf32>
    tpu.vector_store %arg9[%c16, %c0_21], %29 {strides = array<i32>} : memref<36x256xf32, #tpu.memory_space<vmem>>, vector<4x256xf32>,
    %31 = vector.extract_strided_slice %4 {offsets = [0, 1], sizes = [4, 256], strides = [1, 1]} : vector<4x512xf32> to vector<4x256xf32>
    %c5 = arith.constant 5 : index
    %c0_22 = arith.constant 0 : index
    %c0_23 = arith.constant 0 : index
    %32 = vector.load %arg6[%c5, %c0_22, %c0_23] : memref<9x1x256xf32, #tpu.memory_space<vmem>>, vector<1x1x256xf32>
    %33 = vector.shape_cast %32 : vector<1x1x256xf32> to vector<1x256xf32>
    %34 = vector.broadcast %33 : vector<1x256xf32> to vector<4x256xf32>
    %35 = arith.mulf %31, %34 : vector<4x256xf32>
    %c20 = arith.constant 20 : index
    %c0_24 = arith.constant 0 : index
    %36 = vector.load %arg9[%c20, %c0_24] : memref<36x256xf32, #tpu.memory_space<vmem>>, vector<4x256xf32>
    tpu.vector_store %arg9[%c20, %c0_24], %35 {strides = array<i32>} : memref<36x256xf32, #tpu.memory_space<vmem>>, vector<4x256xf32>,
    %37 = vector.extract_strided_slice %4 {offsets = [0, 15], sizes = [4, 256], strides = [1, 1]} : vector<4x512xf32> to vector<4x256xf32>
    %c6 = arith.constant 6 : index
    %c0_25 = arith.constant 0 : index
    %c0_26 = arith.constant 0 : index
    %38 = vector.load %arg6[%c6, %c0_25, %c0_26] : memref<9x1x256xf32, #tpu.memory_space<vmem>>, vector<1x1x256xf32>
    %39 = vector.shape_cast %38 : vector<1x1x256xf32> to vector<1x256xf32>
    %40 = vector.broadcast %39 : vector<1x256xf32> to vector<4x256xf32>
    %41 = arith.mulf %37, %40 : vector<4x256xf32>
    %c24 = arith.constant 24 : index
    %c0_27 = arith.constant 0 : index
    %42 = vector.load %arg9[%c24, %c0_27] : memref<36x256xf32, #tpu.memory_space<vmem>>, vector<4x256xf32>
    tpu.vector_store %arg9[%c24, %c0_27], %41 {strides = array<i32>} : memref<36x256xf32, #tpu.memory_space<vmem>>, vector<4x256xf32>,
    %43 = vector.extract_strided_slice %4 {offsets = [0, 16], sizes = [4, 256], strides = [1, 1]} : vector<4x512xf32> to vector<4x256xf32>
    %c7 = arith.constant 7 : index
    %c0_28 = arith.constant 0 : index
    %c0_29 = arith.constant 0 : index
    %44 = vector.load %arg6[%c7, %c0_28, %c0_29] : memref<9x1x256xf32, #tpu.memory_space<vmem>>, vector<1x1x256xf32>
    %45 = vector.shape_cast %44 : vector<1x1x256xf32> to vector<1x256xf32>
    %46 = vector.broadcast %45 : vector<1x256xf32> to vector<4x256xf32>
    %47 = arith.mulf %43, %46 : vector<4x256xf32>
    %c28 = arith.constant 28 : index
    %c0_30 = arith.constant 0 : index
    %48 = vector.load %arg9[%c28, %c0_30] : memref<36x256xf32, #tpu.memory_space<vmem>>, vector<4x256xf32>
    tpu.vector_store %arg9[%c28, %c0_30], %47 {strides = array<i32>} : memref<36x256xf32, #tpu.memory_space<vmem>>, vector<4x256xf32>,
    %49 = vector.extract_strided_slice %4 {offsets = [0, 17], sizes = [4, 256], strides = [1, 1]} : vector<4x512xf32> to vector<4x256xf32>
    %c8_31 = arith.constant 8 : index
    %c0_32 = arith.constant 0 : index
    %c0_33 = arith.constant 0 : index
    %50 = vector.load %arg6[%c8_31, %c0_32, %c0_33] : memref<9x1x256xf32, #tpu.memory_space<vmem>>, vector<1x1x256xf32>
    %51 = vector.shape_cast %50 : vector<1x1x256xf32> to vector<1x256xf32>
    %52 = vector.broadcast %51 : vector<1x256xf32> to vector<4x256xf32>
    %53 = arith.mulf %49, %52 : vector<4x256xf32>
    %c32 = arith.constant 32 : index
    %c0_34 = arith.constant 0 : index
    %54 = vector.load %arg9[%c32, %c0_34] : memref<36x256xf32, #tpu.memory_space<vmem>>, vector<4x256xf32>
    tpu.vector_store %arg9[%c32, %c0_34], %53 {strides = array<i32>} : memref<36x256xf32, #tpu.memory_space<vmem>>, vector<4x256xf32>,
    %c0_35 = arith.constant 0 : index
    %c0_36 = arith.constant 0 : index
    %55 = vector.load %arg2[%c0_35, %c0_36] : memref<4x36xf32, #tpu.memory_space<vmem>>, vector<4x36xf32>
    %c0_37 = arith.constant 0 : index
    %c0_38 = arith.constant 0 : index
    %56 = vector.load %arg9[%c0_37, %c0_38] : memref<36x256xf32, #tpu.memory_space<vmem>>, vector<36x256xf32>
    %cst = arith.constant dense<0.000000e+00> : vector<4x256xf32>
    %57 = tpu.matmul %55, %56, %cst {dimension_numbers = #tpu.dot_dimension_numbers<[1], [0], [0], [1], [0, 0, 1, 1], [], []>} : vector<4x36xf32>, vector<36x256xf32>, vector<4x256xf32> -> vector<4x256xf32>
    %c0_39 = arith.constant 0 : index
    %c0_40 = arith.constant 0 : index
    %58 = vector.load %arg3[%c0_39, %c0_40] : memref<4x1xf32, #tpu.memory_space<vmem>>, vector<4x1xf32>
    %59 = vector.broadcast %58 : vector<4x1xf32> to vector<4x256xf32>
    %60 = arith.addf %57, %59 : vector<4x256xf32>
    %cst_41 = arith.constant 0.000000e+00 : f32
    %61 = vector.broadcast %cst_41 : f32 to vector<4x256xf32>
    %62 = arith.maximumf %60, %61 : vector<4x256xf32>
    %c0_42 = arith.constant 0 : index
    %c0_43 = arith.constant 0 : index
    %63 = vector.load %arg8[%c0_42, %c0_43] : memref<4x512xf32, #tpu.memory_space<vmem>>, vector<4x256xf32>
    tpu.vector_store %arg8[%c0_42, %c0_43], %62 {strides = array<i32>} : memref<4x512xf32, #tpu.memory_space<vmem>>, vector<4x256xf32>,
    %c0_44 = arith.constant 0 : index
    %c256_45 = arith.constant 256 : index
    %64 = vector.load %arg8[%c0_44, %c256_45] : memref<4x512xf32, #tpu.memory_space<vmem>>, vector<4x256xf32>
    tpu.vector_store %arg8[%c0_44, %c256_45], %62 {strides = array<i32>} : memref<4x512xf32, #tpu.memory_space<vmem>>, vector<4x256xf32>,
    %c0_46 = arith.constant 0 : index
    %c0_47 = arith.constant 0 : index
    %65 = vector.load %arg8[%c0_46, %c0_47] : memref<4x512xf32, #tpu.memory_space<vmem>>, vector<4x512xf32>
    %66 = vector.extract_strided_slice %65 {offsets = [0, 239], sizes = [4, 256], strides = [1, 1]} : vector<4x512xf32> to vector<4x256xf32>
    %c0_48 = arith.constant 0 : index
    %c0_49 = arith.constant 0 : index
    %c0_50 = arith.constant 0 : index
    %67 = vector.load %arg6[%c0_48, %c0_49, %c0_50] : memref<9x1x256xf32, #tpu.memory_space<vmem>>, vector<1x1x256xf32>
    %68 = vector.shape_cast %67 : vector<1x1x256xf32> to vector<1x256xf32>
    %69 = vector.broadcast %68 : vector<1x256xf32> to vector<4x256xf32>
    %70 = arith.mulf %66, %69 : vector<4x256xf32>
    %c0_51 = arith.constant 0 : index
    %c0_52 = arith.constant 0 : index
    %71 = vector.load %arg9[%c0_51, %c0_52] : memref<36x256xf32, #tpu.memory_space<vmem>>, vector<4x256xf32>
    tpu.vector_store %arg9[%c0_51, %c0_52], %70 {strides = array<i32>} : memref<36x256xf32, #tpu.memory_space<vmem>>, vector<4x256xf32>,
    %72 = vector.extract_strided_slice %65 {offsets = [0, 240], sizes = [4, 256], strides = [1, 1]} : vector<4x512xf32> to vector<4x256xf32>
    %c1_53 = arith.constant 1 : index
    %c0_54 = arith.constant 0 : index
    %c0_55 = arith.constant 0 : index
    %73 = vector.load %arg6[%c1_53, %c0_54, %c0_55] : memref<9x1x256xf32, #tpu.memory_space<vmem>>, vector<1x1x256xf32>
    %74 = vector.shape_cast %73 : vector<1x1x256xf32> to vector<1x256xf32>
    %75 = vector.broadcast %74 : vector<1x256xf32> to vector<4x256xf32>
    %76 = arith.mulf %72, %75 : vector<4x256xf32>
    %c4_56 = arith.constant 4 : index
    %c0_57 = arith.constant 0 : index
    %77 = vector.load %arg9[%c4_56, %c0_57] : memref<36x256xf32, #tpu.memory_space<vmem>>, vector<4x256xf32>
    tpu.vector_store %arg9[%c4_56, %c0_57], %76 {strides = array<i32>} : memref<36x256xf32, #tpu.memory_space<vmem>>, vector<4x256xf32>,
    %78 = vector.extract_strided_slice %65 {offsets = [0, 241], sizes = [4, 256], strides = [1, 1]} : vector<4x512xf32> to vector<4x256xf32>
    %c2_58 = arith.constant 2 : index
    %c0_59 = arith.constant 0 : index
    %c0_60 = arith.constant 0 : index
    %79 = vector.load %arg6[%c2_58, %c0_59, %c0_60] : memref<9x1x256xf32, #tpu.memory_space<vmem>>, vector<1x1x256xf32>
    %80 = vector.shape_cast %79 : vector<1x1x256xf32> to vector<1x256xf32>
    %81 = vector.broadcast %80 : vector<1x256xf32> to vector<4x256xf32>
    %82 = arith.mulf %78, %81 : vector<4x256xf32>
    %c8_61 = arith.constant 8 : index
    %c0_62 = arith.constant 0 : index
    %83 = vector.load %arg9[%c8_61, %c0_62] : memref<36x256xf32, #tpu.memory_space<vmem>>, vector<4x256xf32>
    tpu.vector_store %arg9[%c8_61, %c0_62], %82 {strides = array<i32>} : memref<36x256xf32, #tpu.memory_space<vmem>>, vector<4x256xf32>,
    %84 = vector.extract_strided_slice %65 {offsets = [0, 255], sizes = [4, 256], strides = [1, 1]} : vector<4x512xf32> to vector<4x256xf32>
    %c3_63 = arith.constant 3 : index
    %c0_64 = arith.constant 0 : index
    %c0_65 = arith.constant 0 : index
    %85 = vector.load %arg6[%c3_63, %c0_64, %c0_65] : memref<9x1x256xf32, #tpu.memory_space<vmem>>, vector<1x1x256xf32>
    %86 = vector.shape_cast %85 : vector<1x1x256xf32> to vector<1x256xf32>
    %87 = vector.broadcast %86 : vector<1x256xf32> to vector<4x256xf32>
    %88 = arith.mulf %84, %87 : vector<4x256xf32>
    %c12_66 = arith.constant 12 : index
    %c0_67 = arith.constant 0 : index
    %89 = vector.load %arg9[%c12_66, %c0_67] : memref<36x256xf32, #tpu.memory_space<vmem>>, vector<4x256xf32>
    tpu.vector_store %arg9[%c12_66, %c0_67], %88 {strides = array<i32>} : memref<36x256xf32, #tpu.memory_space<vmem>>, vector<4x256xf32>,
    %90 = vector.extract_strided_slice %65 {offsets = [0, 0], sizes = [4, 256], strides = [1, 1]} : vector<4x512xf32> to vector<4x256xf32>
    %c16_68 = arith.constant 16 : index
    %c0_69 = arith.constant 0 : index
    %91 = vector.load %arg9[%c16_68, %c0_69] : memref<36x256xf32, #tpu.memory_space<vmem>>, vector<4x256xf32>
    tpu.vector_store %arg9[%c16_68, %c0_69], %90 {strides = array<i32>} : memref<36x256xf32, #tpu.memory_space<vmem>>, vector<4x256xf32>,
    %92 = vector.extract_strided_slice %65 {offsets = [0, 1], sizes = [4, 256], strides = [1, 1]} : vector<4x512xf32> to vector<4x256xf32>
    %c5_70 = arith.constant 5 : index
    %c0_71 = arith.constant 0 : index
    %c0_72 = arith.constant 0 : index
    %93 = vector.load %arg6[%c5_70, %c0_71, %c0_72] : memref<9x1x256xf32, #tpu.memory_space<vmem>>, vector<1x1x256xf32>
    %94 = vector.shape_cast %93 : vector<1x1x256xf32> to vector<1x256xf32>
    %95 = vector.broadcast %94 : vector<1x256xf32> to vector<4x256xf32>
    %96 = arith.mulf %92, %95 : vector<4x256xf32>
    %c20_73 = arith.constant 20 : index
    %c0_74 = arith.constant 0 : index
    %97 = vector.load %arg9[%c20_73, %c0_74] : memref<36x256xf32, #tpu.memory_space<vmem>>, vector<4x256xf32>
    tpu.vector_store %arg9[%c20_73, %c0_74], %96 {strides = array<i32>} : memref<36x256xf32, #tpu.memory_space<vmem>>, vector<4x256xf32>,
    %98 = vector.extract_strided_slice %65 {offsets = [0, 15], sizes = [4, 256], strides = [1, 1]} : vector<4x512xf32> to vector<4x256xf32>
    %c6_75 = arith.constant 6 : index
    %c0_76 = arith.constant 0 : index
    %c0_77 = arith.constant 0 : index
    %99 = vector.load %arg6[%c6_75, %c0_76, %c0_77] : memref<9x1x256xf32, #tpu.memory_space<vmem>>, vector<1x1x256xf32>
    %100 = vector.shape_cast %99 : vector<1x1x256xf32> to vector<1x256xf32>
    %101 = vector.broadcast %100 : vector<1x256xf32> to vector<4x256xf32>
    %102 = arith.mulf %98, %101 : vector<4x256xf32>
    %c24_78 = arith.constant 24 : index
    %c0_79 = arith.constant 0 : index
    %103 = vector.load %arg9[%c24_78, %c0_79] : memref<36x256xf32, #tpu.memory_space<vmem>>, vector<4x256xf32>
    tpu.vector_store %arg9[%c24_78, %c0_79], %102 {strides = array<i32>} : memref<36x256xf32, #tpu.memory_space<vmem>>, vector<4x256xf32>,
    %104 = vector.extract_strided_slice %65 {offsets = [0, 16], sizes = [4, 256], strides = [1, 1]} : vector<4x512xf32> to vector<4x256xf32>
    %c7_80 = arith.constant 7 : index
    %c0_81 = arith.constant 0 : index
    %c0_82 = arith.constant 0 : index
    %105 = vector.load %arg6[%c7_80, %c0_81, %c0_82] : memref<9x1x256xf32, #tpu.memory_space<vmem>>, vector<1x1x256xf32>
    %106 = vector.shape_cast %105 : vector<1x1x256xf32> to vector<1x256xf32>
    %107 = vector.broadcast %106 : vector<1x256xf32> to vector<4x256xf32>
    %108 = arith.mulf %104, %107 : vector<4x256xf32>
    %c28_83 = arith.constant 28 : index
    %c0_84 = arith.constant 0 : index
    %109 = vector.load %arg9[%c28_83, %c0_84] : memref<36x256xf32, #tpu.memory_space<vmem>>, vector<4x256xf32>
    tpu.vector_store %arg9[%c28_83, %c0_84], %108 {strides = array<i32>} : memref<36x256xf32, #tpu.memory_space<vmem>>, vector<4x256xf32>,
    %110 = vector.extract_strided_slice %65 {offsets = [0, 17], sizes = [4, 256], strides = [1, 1]} : vector<4x512xf32> to vector<4x256xf32>
    %c8_85 = arith.constant 8 : index
    %c0_86 = arith.constant 0 : index
    %c0_87 = arith.constant 0 : index
    %111 = vector.load %arg6[%c8_85, %c0_86, %c0_87] : memref<9x1x256xf32, #tpu.memory_space<vmem>>, vector<1x1x256xf32>
    %112 = vector.shape_cast %111 : vector<1x1x256xf32> to vector<1x256xf32>
    %113 = vector.broadcast %112 : vector<1x256xf32> to vector<4x256xf32>
    %114 = arith.mulf %110, %113 : vector<4x256xf32>
    %c32_88 = arith.constant 32 : index
    %c0_89 = arith.constant 0 : index
    %115 = vector.load %arg9[%c32_88, %c0_89] : memref<36x256xf32, #tpu.memory_space<vmem>>, vector<4x256xf32>
    tpu.vector_store %arg9[%c32_88, %c0_89], %114 {strides = array<i32>} : memref<36x256xf32, #tpu.memory_space<vmem>>, vector<4x256xf32>,
    %c0_90 = arith.constant 0 : index
    %c0_91 = arith.constant 0 : index
    %116 = vector.load %arg4[%c0_90, %c0_91] : memref<4x36xf32, #tpu.memory_space<vmem>>, vector<4x36xf32>
    %c0_92 = arith.constant 0 : index
    %c0_93 = arith.constant 0 : index
    %117 = vector.load %arg9[%c0_92, %c0_93] : memref<36x256xf32, #tpu.memory_space<vmem>>, vector<36x256xf32>
    %cst_94 = arith.constant dense<0.000000e+00> : vector<4x256xf32>
    %118 = tpu.matmul %116, %117, %cst_94 {dimension_numbers = #tpu.dot_dimension_numbers<[1], [0], [0], [1], [0, 0, 1, 1], [], []>} : vector<4x36xf32>, vector<36x256xf32>, vector<4x256xf32> -> vector<4x256xf32>
    %c0_95 = arith.constant 0 : index
    %c0_96 = arith.constant 0 : index
    %119 = vector.load %arg5[%c0_95, %c0_96] : memref<4x1xf32, #tpu.memory_space<vmem>>, vector<4x1xf32>
    %120 = vector.broadcast %119 : vector<4x1xf32> to vector<4x256xf32>
    %121 = arith.addf %118, %120 : vector<4x256xf32>
    %122 = arith.addf %121, %1 : vector<4x256xf32>
    %cst_97 = arith.constant 0.000000e+00 : f32
    %123 = vector.broadcast %cst_97 : f32 to vector<4x256xf32>
    %124 = arith.maximumf %122, %123 : vector<4x256xf32>
    %c0_98 = arith.constant 0 : index
    %c0_99 = arith.constant 0 : index
    %c0_100 = arith.constant 0 : index
    %125 = vector.load %arg7[%c0_98, %c0_99, %c0_100] : memref<1x4x256xf32, #tpu.memory_space<vmem>>, vector<1x4x256xf32>
    %126 = vector.shape_cast %125 : vector<1x4x256xf32> to vector<4x256xf32>
    %127 = vector.shape_cast %124 : vector<4x256xf32> to vector<1x4x256xf32>
    tpu.vector_store %arg7[%c0_98, %c0_99, %c0_100], %127 {strides = array<i32>} : memref<1x4x256xf32, #tpu.memory_space<vmem>>, vector<1x4x256xf32>,
    return
  }
  func.func @transform_0(%arg0: i32) -> (i32, i32, i32) {
    %c0_i32 = arith.constant 0 : i32
    %c0_i32_0 = arith.constant 0 : i32
    %c0_i32_1 = arith.constant 0 : i32
    return %arg0, %c0_i32, %c0_i32_0 : i32, i32, i32
  }
  func.func @transform_1(%arg0: i32) -> (i32, i32) {
    %c0_i32 = arith.constant 0 : i32
    %c0_i32_0 = arith.constant 0 : i32
    %c0_i32_1 = arith.constant 0 : i32
    return %c0_i32, %c0_i32_0 : i32, i32
  }
  func.func @transform_2(%arg0: i32) -> (i32, i32) {
    %c0_i32 = arith.constant 0 : i32
    %c0_i32_0 = arith.constant 0 : i32
    %c0_i32_1 = arith.constant 0 : i32
    return %c0_i32, %c0_i32_0 : i32, i32
  }
  func.func @transform_3(%arg0: i32) -> (i32, i32) {
    %c0_i32 = arith.constant 0 : i32
    %c0_i32_0 = arith.constant 0 : i32
    %c0_i32_1 = arith.constant 0 : i32
    return %c0_i32, %c0_i32_0 : i32, i32
  }
  func.func @transform_4(%arg0: i32) -> (i32, i32) {
    %c0_i32 = arith.constant 0 : i32
    %c0_i32_0 = arith.constant 0 : i32
    %c0_i32_1 = arith.constant 0 : i32
    return %c0_i32, %c0_i32_0 : i32, i32
  }
  func.func @transform_5(%arg0: i32) -> (i32, i32, i32) {
    %c0_i32 = arith.constant 0 : i32
    %c0_i32_0 = arith.constant 0 : i32
    %c0_i32_1 = arith.constant 0 : i32
    %c0_i32_2 = arith.constant 0 : i32
    return %c0_i32, %c0_i32_0, %c0_i32_1 : i32, i32, i32
  }
  func.func @transform_6(%arg0: i32) -> (i32, i32, i32) {
    %c0_i32 = arith.constant 0 : i32
    %c0_i32_0 = arith.constant 0 : i32
    %c0_i32_1 = arith.constant 0 : i32
    return %arg0, %c0_i32, %c0_i32_0 : i32, i32, i32
  }
}

</mosaic_0001>

<bundles_post_ra>
// kernel: tpu_custom_call.1
= control target key start
LH: loop header
LB: loop body
LE: loop exit
PB: predicated region body
PF: predicated region fallthrough
CT: control target
= control target key end

     0   :  { %s1850_s0 = inlined_call_operand.hbm [shape: f32[2,4,256], index: 0, kind: input, shape index: {}]   ;;  %s1851_s1 = inlined_call_operand.hbm [shape: f32[4,36], index: 1, kind: input, shape index: {}]   ;;  %s1852_s2 = inlined_call_operand.vmem [shape: f32[4,1], index: 2, kind: input, shape index: {}]   ;;  %s1853_s3 = inlined_call_operand.hbm [shape: f32[4,36], index: 3, kind: input, shape index: {}]   ;;  %s1854_s4 = inlined_call_operand.vmem [shape: f32[4,1], index: 4, kind: input, shape index: {}]   ;;  %s1855_s5 = inlined_call_operand.vmem [shape: f32[9,1,256], index: 5, kind: input, shape index: {}]   ;;  %s1856_s6 = inlined_call_operand.hbm [shape: f32[2,4,256], index: 6, kind: output, shape index: {}]  }
   0x1   :  { %1864 = sst [smem:[#allocation14_spill]] %s1851_s1 }
   0x2   :  { %11 = vsyncpa [#allocation5], 0 }
   0x3   :  { %13 = vsyncpa [#allocation5 + $0x1], 0 }
   0x4   :  { %14 = vsyncpa [#allocation8], 0 }
   0x5   :  { %15 = vsyncpa [#allocation6], 0 }
   0x6   :  { %17 = vsyncpa [#allocation6 + $0x1], 0  ;;  %s1458_s21 = smov 0   ;;  %s1460_s22 = smov 0  }
   0x7   :  { %s1462_s23 = smov 0   ;;  %s1464_s24 = smov 0  }
   0x8 LB: > { %s1479_s25 = sadd.s32 4294967295, %s1407_s24   ;;  %s1139_s26 = sadd.s32 4294967294, %s1407_s24   ;;  %s1407_s24 = sphi %s1464_s24, %s1885_s24   ;;  %s1403_s23 = sphi %s1462_s23, %s1884_s23   ;;  %s1399_s22 = sphi %s1460_s22, %s1883_s22   ;;  %s1395_s21 = sphi %s1458_s21, %s1882_s21  }
   0x9   : > { %p43_p0 = scmp.ne.s32.totalorder %s1399_s22, %s1395_s21  ;;  %p1857_p1 = scmp.eq.s32.totalorder %s1479_s25, 0 }
   0xa   : > { %p178_p3 = scmp.eq.s32.totalorder %s1139_s26, 1  ;;  %p1140_p5 = scmp.ge.s32.totalorder %s1407_s24, 1 }
   0xb   : > { %p1488_p4 = por %p1857_p1, %p43_p0  ;;  %p185_p7 = scmp.lt.s32.totalorder %s1407_s24, 3 }
   0xc   : > { %p1493_p6 = por %p178_p3, %p43_p0  ;;  %s1409_s30 = smov [#allocation7]  }
   0xd   : > { %s1865_s27 = scalar_select %p1488_p4, 1, 0 }
   0xe   : > { %s1866_s28 = scalar_select %p1493_p6, 1, 0 }
   0xf   : > { %p1498_p8 = pnand %p1140_p5, %p185_p7  ;;  %s198_s7 = sshll.u32 %s1409_s30, 4  ;;  %s199_s7 = int_to_ptr.vmem [resolvable:$true] %s198_s7 }
  0x10   : > { %s1410_s8 = smov [#allocation9]   ;;  %s1512_s11 = sadd.s32 1, %s1407_s24  }
  0x11   : > { %s1867_s29 = scalar_select %p1498_p8, 1, 0 }
  0x12   : > { %p1192_p10 = pneg %p1498_p8  ;;  %s212_s9 = sshll.u32 %s1410_s8, 4  ;;  %s213_s9 = int_to_ptr.vmem [resolvable:$true] %s212_s9 }
  0x13   : > { %s27_s12 = ssub.s32 %s1407_s24, %s1512_s11  ;;  %s1270_s13 = scalar_lea.vmem %s199_s7, 64 }
  0x14   : > { %p1507_p11 = pnand %p1192_p10, %p1857_p1  ;;  %p1271_p13 = scmp.ne.s32.totalorder %s199_s7, %s1270_s13 }
  0x15   : > { %p1278_p5 = scmp.lt.s32.totalorder %s199_s7, %s199_s7  ;;  %p1279_p7 = scmp.lt.s32.totalorder %s1270_s13, %s1270_s13 }
  0x16   : > { %p1261_p12 = pneg %p1507_p11 }
  0x17   : > { %p1280_p10 = por %p1279_p7, %p1278_p5 }
  0x18   : > { %p1273_p0 = pnand %p1271_p13, %p1261_p12 }
  0x1a   : > { %p1274_p3 = pneg %p1273_p0 }
  0x1c   : > { %p1281_p9 = pnand %p1280_p10, %p1274_p3 }
  0x1e   : > { %1284 = shalt.err (!%p1281_p9)
}
  0x1f   : > { %s1869_s1 = sld [smem:[#allocation14_spill]]  ;;  %s1296_s16 = scalar_lea.vmem %s213_s9, 64 }
  0x20   : > { %p1297_p1 = scmp.ne.s32.totalorder %s213_s9, %s1296_s16  ;;  %p1304_p13 = scmp.lt.s32.totalorder %s213_s9, %s213_s9 }
  0x21   : > { %p1305_p0 = scmp.lt.s32.totalorder %s1296_s16, %s1296_s16 }
  0x22   : > { %p1299_p2 = pnand %p1297_p1, %p1261_p12 }
  0x23   : > { %p1306_p4 = por %p1305_p0, %p1304_p13 }
  0x24   : > { %p1300_p6 = pneg %p1299_p2 }
  0x25   : > { %1195 = dma.hbm_to_vmem [thread:$0]  (!%p1507_p11), %s1869_s1, 64, %s199_s7, [#allocation8]  }
  0x26   : > { %p1307_p8 = pnand %p1306_p4, %p1300_p6 }
  0x28   : > { %1310 = shalt.err (!%p1307_p8)
}
  0x29   : > { %1198 = dma.hbm_to_vmem [thread:$0]  (!%p1507_p11), %s1853_s3, 64, %s213_s9, [#allocation8]  }
  0x2a   : > { %p28_p1 = scmp.eq.s32.totalorder %s27_s12, 0  ;;  %s30_s19 = sadd.s32 1, %s1403_s23 }
  0x2b   : > { %p37_p2 = scmp.ne.s32.totalorder %s1403_s23, %s1399_s22  ;;  %p38_p4 = scmp.eq.s32.totalorder %s1407_s24, 0 }
  0x2c   : > { %s1539_s20 = scalar_select %p28_p1, %s1403_s23, %s30_s19  }
  0x2d   : > { %p39_p6 = por %p38_p4, %p37_p2  ;;  %p1870_p8 = scmp.eq.s32.totalorder %s1479_s25, 1 }
  0x2e   : > { %p1209_p12 = scmp.lt.s32.totalorder %s1407_s24, 2  ;;  %s229_s30 = sand.u32 1, %s1403_s23  }
  0x2f   : > { %p1543_p9 = por %p1870_p8, %p37_p2  ;;  %s1144_s7 = sshll.u32 %s229_s30, 3 }
  0x30   : > { %s1177_s8 = sshll.u32 %s1407_s24, 7  ;;  %s233_s12 = scalar_lea.vmem [#allocation4], %s1144_s7 }
  0x31   : > { %s1871_s26 = scalar_select %p1543_p9, 1, 0 }
  0x32   : > { %s1553_s9 = scalar_lea.hbm %s1850_s0, %s1177_s8  ;;  %s241_s14 = sshll.u32 %s233_s12, 4  ;;  %s242_s14 = int_to_ptr.vmem [resolvable:$true] %s241_s14 }
  0x33   : > { %p1555_p11 = pnand %p1209_p12, %p39_p6  ;;  %s230_s16 = scalar_lea.sflag [#allocation5], %s229_s30 }
  0x34   : > { %s1311_s17 = scalar_lea.hbm %s1553_s9, 128  ;;  %s1316_s8 = scalar_lea.hbm %s1850_s0, 256 }
  0x35   : > { %p1312_p3 = scmp.ne.s32.totalorder %s1553_s9, %s1311_s17  ;;  %p1313_p5 = pneg %p1555_p11 }
  0x36   : > { %p1317_p13 = scmp.lt.s32.totalorder %s1553_s9, %s1850_s0  ;;  %p1318_p0 = scmp.lt.s32.totalorder %s1316_s8, %s1311_s17 }
  0x37   : > { %p1314_p7 = pnand %p1313_p5, %p1312_p3 }
  0x38   : > { %p1319_p1 = por %p1318_p0, %p1317_p13 }
  0x39   : > { %p1315_p10 = pneg %p1314_p7 }
  0x3b   : > { %p1320_p2 = pnand %p1319_p1, %p1315_p10 }
  0x3d   : > { %1323 = shalt.err (!%p1320_p2)
}
  0x3e   : > { %s1324_s13 = scalar_lea.vmem %s242_s14, 128  ;;  %s1411_s30 = smov [#allocation4]  }
  0x3f   : > { %p1325_p4 = scmp.ne.s32.totalorder %s242_s14, %s1324_s13  ;;  %s1329_s12 = sshll.u32 %s1411_s30, 4  ;;  %s1330_s12 = int_to_ptr.vmem [resolvable:$false] %s1329_s12 }
  0x40   : > { %s1331_s1 = scalar_lea.vmem %s1330_s12, 256  ;;  %p1332_p12 = scmp.lt.s32.totalorder %s242_s14, %s1330_s12 }
  0x41   : > { %p1327_p6 = pnand %p1325_p4, %p1313_p5  ;;  %p1333_p3 = scmp.lt.s32.totalorder %s1331_s1, %s1324_s13 }
  0x43   : > { %p1328_p8 = pneg %p1327_p6  ;;  %p1334_p7 = por %p1333_p3, %p1332_p12 }
  0x45   : > { %p1335_p9 = pnand %p1334_p7, %p1328_p8 }
  0x47   : > { %1338 = shalt.err (!%p1335_p9)
}
  0x48   : > { %1202 = dma.hbm_to_vmem [thread:$0]  (!%p1555_p11), %s1553_s9, 128, %s242_s14, %s230_s16  }
  0x49   : > { %p1873_p10 = scmp.ne.s32.totalorder %s1867_s29, 0 }
  0x4a   : > { %s1576_s17 = sand.u32 (!%p1873_p10), 1, %s1399_s22   ;;  %p1874_p5 = scmp.ne.s32.totalorder (!%p1873_p10), %s1865_s27, 0 }
  0x4b   : > { %250 = sbr.rel (%p1873_p10) target bundleno = 951 (0x3b7), region = 44  ;;  %s1861_s18 = sshll.u32 (!%p1873_p10), %s1576_s17, 3 }
  0x4c   : > { %s253_s19 = scalar_lea.sflag (!%p1873_p10), [#allocation5], %s1576_s17  ;;  %s256_s1 = scalar_lea.vmem (!%p1873_p10), [#allocation4], %s1861_s18 }
  0x50   : > { %1382 = dma.done.wait (%p1874_p5), %s253_s19, 128  }
  0x51   : > { %1384 = vsyncadd (%p1874_p5), %s253_s19, 4294967168  ;;  %p1875_p9 = scmp.eq.s32.totalorder %s1479_s25, 0 }
  0x53   : > { %1386 = dma.done.wait (%p1875_p9), [#allocation8], 128   ;;  %p1876_p11 = pmov %p1875_p9 }
  0x54   : > { %v300_v0 = vlaneseq  ;;  %v1158_v4 = vld [vmem:[%s1855_s5 + $0x10] sm:$0x3]  ;;  %v1157_v5 = vld [vmem:[%s1855_s5 + $0xe] sm:$0x3]  ;;  %v1156_v6 = vld [vmem:[%s1855_s5 + $0xc] sm:$0x3] }
  0x55   : > { %1388 = vsyncadd (%p1876_p11), [#allocation8], 4294967168  ;;  %v1155_v11 = vld [vmem:[%s1855_s5 + $0xa] sm:$0x3]  ;;  %v1610_v12 = vld [vmem:[%s256_s1] sm:$0xff]  ;;  %s1412_s7 = smov 17  }
  0x56   : > { %v301_v1 = vshrl.u32 %v300_v0, 7  ;;  %418 = vst [vmem:[#allocation3 + $0x48] sm:$0xf] %v1610_v12  ;;  %s1413_s13 = smov 16   ;;  %s1414_s30 = smov 15   ;;  %vm347_vm0 = vcmask 130048  }
  0x57   : > { %s1415_s12 = smov 1   ;;  %v1153_v25 = vld [vmem:[%s1855_s5 + $0x4] sm:$0x3]  ;;  %vm318_vm1 = vcmask 138240   ;;  %vm376_vm2 = vcmask 121856   ;;  %s1416_s29 = smov 111  }
  0x58   : > { %v1590_v2 = vsub.s32 0, %v301_v1  ;;  %v1592_v3 = vsub.s32 1, %v301_v1  ;;  %v1154_v34 = vld [vmem:[%s1855_s5 + $0x6] sm:$0x3]  ;;  %vm405_vm3 = vcmask 7168   ;;  %s1417_s15 = smov 112  }
  0x59   : > { %s1418_s27 = smov 113   ;;  %v298_v46 = vld [vmem:[%s1855_s5] sm:$0x3]  ;;  %vm316_vm4 = vcmask 1043456   ;;  %v1152_v62 = vld [vmem:[%s1855_s5 + $0x2] sm:$0x3] }
  0x5a   : > { %v536_v7 = vrot.slane %v1158_v4, %v1590_v2  ;;  %v540_v8 = vrot.slane %v1158_v4, %v1592_v3  ;;  %v499_v9 = vrot.slane %v1157_v5, %v1590_v2  ;;  %v503_v10 = vrot.slane %v1157_v5, %v1592_v3  ;;  %s1862_s1 = smov 127   ;;  %s1877_s18 = smov 127  }
  0x5b   : > { %v463_v13 = vrot.slane %v1156_v6, %v1590_v2  ;;  %v467_v14 = vrot.slane %v1156_v6, %v1592_v3  ;;  %v426_v15 = vrot.slane %v1155_v11, %v1590_v2  ;;  %v430_v16 = vrot.slane %v1155_v11, %v1592_v3  ;;  %s1178_s10 = sshll.u32 %s1479_s25, 7  ;;  %s1878_s19 = sshll.u32 %s1576_s17, 3 }
  0x5c   : > { %v541_v17 = vcombine.low %v536_v7, %v540_v8  ;;  %v504_v18 = vcombine.low %v499_v9, %v503_v10  ;;  %v364_v32 = vrot.slane %v1153_v25, %v1590_v2  ;;  %v368_v33 = vrot.slane %v1153_v25, %v1592_v3  ;;  %s292_s9 = scalar_lea.vmem [#allocation10], %s1878_s19  ;;  %p1879_p0 = scmp.ne.s32.totalorder %s1871_s26, 0 }
  0x5d   : > { %v468_v19 = vcombine.low %v463_v13, %v467_v14  ;;  %v431_v20 = vcombine.low %v426_v15, %v430_v16  ;;  %v393_v41 = vrot.slane %v1154_v34, %v1590_v2  ;;  %v397_v42 = vrot.slane %v1154_v34, %v1592_v3  ;;  %s1050_s14 = sshll.u32 %s292_s9, 4  ;;  %s1051_s14 = int_to_ptr.vmem [resolvable:$true] %s1050_s14 }
  0x5e   : > { %542 = vrot.lane.b32.xlu0 %v541_v17, %s1412_s7  ;;  %505 = vrot.lane.b32.xlu1 %v504_v18, %s1413_s13  ;;  %v379_v44 = vcombine.low %v364_v32, %v368_v33  ;;  %v303_v56 = vrot.slane %v298_v46, %v1590_v2  ;;  %v307_v57 = vrot.slane %v298_v46, %v1592_v3  ;;  %vm523_vm5 = vcmask 916480  }
  0x5f   : > { %v408_v54 = vcombine.low %v393_v41, %v397_v42  ;;  %v1685_v4 = vcombine.high %v1610_v12, %v1610_v12  ;;  %v335_v8 = vrot.slane %v1152_v62, %v1590_v2  ;;  %v339_v9 = vrot.slane %v1152_v62, %v1592_v3  ;;  %v1166_v41 = vld [vmem:[%s1855_s5 + $0xc] sm:$0x3]  ;;  %v1167_v42 = vld [vmem:[%s1855_s5 + $0xe] sm:$0x3] }
  0x60   : > { %v321_v13 = vcombine.low %v303_v56, %v307_v57  ;;  %v866_v46 = vrot.slane %v1167_v42, %v1592_v3  ;;  %vm559_vm6 = vcmask 908288   ;;  %vm486_vm7 = vcmask 924672  }
  0x61   : > { %419 = vst [vmem:[#allocation3 + $0x28] sm:$0xf] %v1685_v4  ;;  %vm450_vm8 = vcmask 1039360   ;;  %vm583_vm9 = vcmask 293888  }
  0x62   : > { %469 = vrot.lane.b32.xlu0 %v468_v19, %s1414_s30  ;;  %432 = vrot.lane.b32.xlu1 %v431_v20, %s1415_s12 }
  0x66   : > { %371 = vrot.lane.b32.xlu1 %v1610_v12, %s1414_s30  ;;  %369 = vrot.lane.b32.xlu0 %v1610_v12, %s1414_s30 }
  0x6a   : > { %400 = vrot.lane.b32.xlu1 %v1610_v12, %s1415_s12  ;;  %398 = vrot.lane.b32.xlu0 %v1610_v12, %s1415_s12 }
  0x6e   : > { %312 = vrot.lane.b32.xlu1 %v1610_v12, %s1412_s7  ;;  %310 = vrot.lane.b32.xlu0 %v1610_v12, %s1412_s7 }
  0x72   : > { %340 = vrot.lane.b32.xlu1 %v1610_v12, %s1413_s13  ;;  %342 = vrot.lane.b32.xlu0 %v1610_v12, %s1413_s13 }
  0xd0   : > { %v543_v21 = vpop.permute.xlu0 %542  ;;  %v506_v22 = vpop.permute.xlu1 %505 }
  0xd1   : > { %v544_v23 = vrot.slane %v543_v21, 4  ;;  %v507_v24 = vrot.slane %v506_v22, 4 }
  0xd3   : > { %v549_v26 = vmul.f32 %v544_v23, %v1610_v12  ;;  %v508_v27 = vsel %vm347_vm0, %v507_v24, %v506_v22  ;;  %v545_v37 = vsel %vm318_vm1, %v544_v23, %v543_v21  ;;  %v512_v49 = vmul.f32 %v507_v24, %v1610_v12 }
  0xd4   : > { %v470_v28 = vpop.permute.xlu0 %469  ;;  %v1642_v29 = vpop.permute.xlu1 %432  ;;  %v1645_v30 = vmul.f32 %v508_v27, %v1610_v12  ;;  %v548_v48 = vmul.f32 %v545_v37, %v1610_v12  ;;  %v350_v24 = vcombine.low %v335_v8, %v339_v9 }
  0xd5   : > { %v471_v31 = vrot.slane %v470_v28, 4  ;;  %557 = vrot.lane.b32.xlu1 %v549_v26, %s1416_s29  ;;  %v434_v35 = vrot.slane %v1642_v29, 4  ;;  %v516_v63 = vcombine.low %v512_v49, %v512_v49 }
  0xd6   : > { %v552_v15 = vcombine.high %v548_v48, %v548_v48  ;;  %v515_v26 = vcombine.low %v1645_v30, %v1645_v30 }
  0xd7   : > { %v476_v36 = vmul.f32 %v471_v31, %v1610_v12  ;;  %v472_v38 = vsel %vm376_vm2, %v471_v31, %v470_v28  ;;  %v435_v47 = vsel %vm405_vm3, %v434_v35, %v1642_v29  ;;  %v439_v27 = vmul.f32 %v434_v35, %v1610_v12  ;;  %v1168_v35 = vld [vmem:[%s1855_s5 + $0x10] sm:$0x3] }
  0xd8   : > { %v372_v39 = vpop.permute.xlu1 %371  ;;  %v370_v40 = vpop.permute.xlu0 %369  ;;  %v475_v50 = vmul.f32 %v472_v38, %v1610_v12  ;;  %v438_v58 = vmul.f32 %v435_v47, %v1610_v12  ;;  %v1420_v29 = vmov 0.0   ;;  %v1421_v38 = vmov 0   ;;  %v1165_v47 = vld [vmem:[%s1855_s5 + $0xa] sm:$0x3] }
  0xd9   : > { %519 = vrot.lane.b32.xlu1 %v1645_v30, %s1417_s15  ;;  %484 = vrot.lane.b32.xlu0 %v476_v36, %s1418_s27  ;;  %v374_v43 = vrot.slane %v372_v39, 4  ;;  %v373_v45 = vrot.slane %v370_v40, 4  ;;  %v443_v36 = vcombine.low %v439_v27, %v439_v27  ;;  %v577_v30 = vld [vmem:[%s1852_s2] sm:$0xf]  ;;  %v901_v40 = vrot.slane %v1168_v35, %v1592_v3 }
  0xda   : > { %v479_v16 = vcombine.high %v475_v50, %v475_v50  ;;  %v442_v28 = vcombine.low %v438_v58, %v438_v58  ;;  %657 = vmatprep.mubr.f32.mxu0 %v1420_v29  ;;  %1016 = vmatprep.mubr.f32.mxu1 %v1420_v29 }
  0xdb   : > { %v375_v51 = vsel %vm316_vm4, %v373_v45, %v374_v43  ;;  %1257 = vset.pattern.permute.xlu0 %v1421_v38  ;;  %v828_v43 = vrot.slane %v1166_v41, %v1590_v2  ;;  %v862_v45 = vrot.slane %v1167_v42, %v1590_v2 }
  0xdc   : > { %v377_v52 = vsel %vm376_vm2, %v375_v51, %v372_v39  ;;  %v401_v53 = vpop.permute.xlu1 %400  ;;  %v399_v55 = vpop.permute.xlu0 %398  ;;  %v897_v39 = vrot.slane %v1168_v35, %v1590_v2  ;;  %v793_v51 = vrot.slane %v1165_v47, %v1590_v2 }
  0xdd   : > { %553 = vrot.lane.b32.xlu0 %v548_v48, %s1416_s29  ;;  %480 = vrot.lane.b32.xlu1 %v475_v50, %s1418_s27  ;;  %v381_v59 = vmul.f32 %v379_v44, %v377_v52  ;;  %v403_v60 = vrot.slane %v401_v53, 4  ;;  %v402_v61 = vrot.slane %v399_v55, 4  ;;  %v832_v44 = vrot.slane %v1166_v41, %v1592_v3 }
  0xde   : > { %v902_v48 = vcombine.low %v897_v39, %v901_v40  ;;  %v867_v49 = vcombine.low %v862_v45, %v866_v46  ;;  %v797_v52 = vrot.slane %v1165_v47, %v1592_v3 }
  0xdf   : > { %v383_v0 = vcombine.high %v381_v59, %v381_v59  ;;  %385 = vst [vmem:[#allocation3 + $0x18] sm:$0xf] %v381_v59  ;;  %v404_v1 = vsel %vm316_vm4, %v402_v61, %v403_v60  ;;  %v833_v50 = vcombine.low %v828_v43, %v832_v44 }
  0xe0   : > { %v406_v5 = vsel %vm405_vm3, %v404_v1, %v401_v53  ;;  %v313_v6 = vpop.permute.xlu1 %312  ;;  %v311_v7 = vpop.permute.xlu0 %310  ;;  %v798_v53 = vcombine.low %v793_v51, %v797_v52 }
  0xe1   : > { %521 = vrot.lane.b32.xlu0 %v516_v63, %s1417_s15  ;;  %446 = vrot.lane.b32.xlu1 %v438_v58, %s1862_s1  ;;  %386 = vst [vmem:[#allocation3 + $0x10] sm:$0xf] %v383_v0  ;;  %v410_v10 = vmul.f32 %v408_v54, %v406_v5  ;;  %v315_v11 = vrot.slane %v313_v6, 4  ;;  %v314_v14 = vrot.slane %v311_v7, 4 }
  0xe3   : > { %v412_v17 = vcombine.low %v410_v10, %v410_v10  ;;  %415 = vst [vmem:[#allocation3 + $0x10] sm:$0xf0] %v410_v10  ;;  %v317_v18 = vsel %vm316_vm4, %v314_v14, %v315_v11 }
  0xe4   : > { %v319_v19 = vsel %vm318_vm1, %v317_v18, %v313_v6  ;;  %v341_v20 = vpop.permute.xlu1 %340  ;;  %v343_v21 = vpop.permute.xlu0 %342 }
  0xe5   : > { %555 = vrot.lane.b32.xlu0 %v552_v15, %s1416_s29  ;;  %482 = vrot.lane.b32.xlu1 %v479_v16, %s1418_s27  ;;  %414 = vst [vmem:[#allocation3 + $0x18] sm:$0xf0] %v412_v17  ;;  %v323_v22 = vmul.f32 %v321_v13, %v319_v19  ;;  %v344_v23 = vrot.slane %v341_v20, 4  ;;  %v345_v25 = vrot.slane %v343_v21, 4 }
  0xe7   : > { %v325_v31 = vcombine.high %v323_v22, %v323_v22  ;;  %327 = vst [vmem:[#allocation3 + $0x30] sm:$0xf] %v323_v22  ;;  %v346_v32 = vsel %vm316_vm4, %v344_v23, %v345_v25  ;;  %v566_v23 = vld [vmem:[#allocation7] sm:$0xf] }
  0xe8   : > { %v348_v33 = vsel %vm347_vm0, %v346_v32, %v343_v21 }
  0xe9   : > { %517 = vrot.lane.b32.xlu0 %v515_v26, %s1417_s15  ;;  %444 = vrot.lane.b32.xlu1 %v442_v28, %s1862_s1  ;;  %328 = vst [vmem:[#allocation3] sm:$0xf] %v325_v31  ;;  %v352_v34 = vmul.f32 %v350_v24, %v348_v33 }
  0xea   : > { %v570_v20 = vld [vmem:[#allocation3 + $0x10] sm:$0xff] }
  0xeb   : > { %v354_v37 = vcombine.low %v352_v34, %v352_v34  ;;  %357 = vst [vmem:[#allocation3] sm:$0xf0] %v352_v34 }
  0xec   : > { %v569_v21 = vld [vmem:[#allocation3 + $0x18] sm:$0xff] }
  0xed   : > { %448 = vrot.lane.b32.xlu0 %v443_v36, %s1862_s1  ;;  %356 = vst [vmem:[#allocation3 + $0x30] sm:$0xf0] %v354_v37  ;;  %903 = vrot.lane.b32.xlu1 %v902_v48, %s1412_s7 }
  0xf1   : > { %580 = vperm.xlu0 %1257, %v577_v30   ;;  %834 = vrot.lane.b32.xlu1 %v833_v50, %s1414_s30 }
  0xf2   : > { %v568_v22 = vld [vmem:[#allocation3] sm:$0xff] }
  0xf4   : > { %v567_v24 = vld [vmem:[#allocation3 + $0x30] sm:$0xff] }
  0xf5   : > { %868 = vrot.lane.b32.xlu0 %v867_v49, %s1413_s13  ;;  %799 = vrot.lane.b32.xlu1 %v798_v53, %s1415_s12 }
 0x147   : > { %v558_v54 = vpop.permute.xlu1 %557 }
 0x14b   : > { %v520_v55 = vpop.permute.xlu1 %519  ;;  %v485_v56 = vpop.permute.xlu0 %484 }
 0x14f   : > { %v554_v57 = vpop.permute.xlu0 %553  ;;  %v481_v58 = vpop.permute.xlu1 %480 }
 0x153   : > { %v522_v59 = vpop.permute.xlu0 %521  ;;  %v447_v60 = vpop.permute.xlu1 %446 }
 0x154   : > { %v525_v61 = vsel %vm523_vm5, %v520_v55, %v522_v59 }
 0x155   : > { %529 = vst [vmem:[#allocation3 + $0x20] sm:$0xf0] %v525_v61  ;;  %v1163_v61 = vld [vmem:[%s1855_s5 + $0x4] sm:$0x3] }
 0x157   : > { %v556_v62 = vpop.permute.xlu0 %555  ;;  %v483_v63 = vpop.permute.xlu1 %482 }
 0x158   : > { %v560_v0 = vsel %vm559_vm6, %v554_v57, %v556_v62  ;;  %v561_v1 = vsel %vm559_vm6, %v556_v62, %v558_v54  ;;  %v487_v5 = vsel %vm486_vm7, %v481_v58, %v483_v63  ;;  %v488_v6 = vsel %vm486_vm7, %v483_v63, %v485_v56 }
 0x159   : > { %564 = vst [vmem:[#allocation3 + $0x40] sm:$0xf] %v560_v0  ;;  %565 = vst [vmem:[#allocation3 + $0x38] sm:$0xf] %v561_v1  ;;  %v735_v62 = vrot.slane %v1163_v61, %v1590_v2  ;;  %v739_v63 = vrot.slane %v1163_v61, %v1592_v3  ;;  %v1164_v0 = vld [vmem:[%s1855_s5 + $0x6] sm:$0x3] }
 0x15a   : > { %491 = vst [vmem:[#allocation3 + $0x8] sm:$0xf] %v487_v5  ;;  %492 = vst [vmem:[#allocation3 + $0x20] sm:$0xf] %v488_v6 }
 0x15b   : > { %v518_v7 = vpop.permute.xlu0 %517  ;;  %v445_v8 = vpop.permute.xlu1 %444 }
 0x15c   : > { %v524_v9 = vsel %vm523_vm5, %v518_v7, %v520_v55  ;;  %v451_v10 = vsel %vm450_vm8, %v445_v8, %v447_v60  ;;  %v749_v7 = vcombine.low %v735_v62, %v739_v63 }
 0x15d   : > { %528 = vst [vmem:[#allocation3 + $0x8] sm:$0xf0] %v524_v9  ;;  %455 = vst [vmem:[#allocation3 + $0x48] sm:$0xf0] %v451_v10  ;;  %v762_v9 = vrot.slane %v1164_v0, %v1590_v2  ;;  %v766_v10 = vrot.slane %v1164_v0, %v1592_v3 }
 0x15f   : > { %v449_v11 = vpop.permute.xlu0 %448  ;;  %v904_v37 = vpop.permute.xlu1 %903 }
 0x160   : > { %v452_v13 = vsel %vm450_vm8, %v447_v60, %v449_v11  ;;  %v576_v14 = vld [vmem:[#allocation3 + $0x38] sm:$0xf]  ;;  %v575_v15 = vld [vmem:[#allocation3 + $0x40] sm:$0xf]  ;;  %v905_v29 = vrot.slane %v904_v37, 4 }
 0x161   : > { %456 = vst [vmem:[#allocation3 + $0x28] sm:$0xf0] %v452_v13  ;;  %1159 = vmatprep.subr.msk.mxu0 %vm316_vm4, %v576_v14  ;;  %v574_v16 = vld [vmem:[#allocation3 + $0x20] sm:$0xff] }
 0x162   : > { %1160 = vmatpush1.msk.msra.mxu0 %vm316_vm4, %v575_v15  ;;  %v906_v39 = vsel %vm318_vm1, %v905_v29, %v904_v37  ;;  %v937_v60 = vld [vmem:[%s1854_s4] sm:$0xf] }
 0x163   : > { %617 = vmatprep.subr.mxu0 %v574_v16  ;;  %v835_v35 = vpop.permute.xlu1 %834  ;;  %v674_v11 = vld [vmem:[%s1855_s5] sm:$0x3] }
 0x164   : > { %v573_v17 = vld [vmem:[#allocation3 + $0x8] sm:$0xff]  ;;  %v836_v41 = vrot.slane %v835_v35, 4 }
 0x165   : > { %618 = vmatpush1.msra.mxu0 %v573_v17  ;;  %v571_v19 = vld [vmem:[#allocation3 + $0x48] sm:$0xff] }
 0x166   : > { %v837_v46 = vsel %vm376_vm2, %v836_v41, %v835_v35 }
 0x167   : > { %v800_v44 = vpop.permute.xlu1 %799 }
 0x168   : > { %v572_v18 = vld [vmem:[#allocation3 + $0x28] sm:$0xff]  ;;  %v801_v47 = vrot.slane %v800_v44, 4 }
 0x169   : > { %619 = vmatprep.subr.mxu0 %v572_v18  ;;  %v679_v18 = vrot.slane %v674_v11, %v1590_v2 }
 0x16a   : > { %620 = vmatpush1.msra.mxu0 %v571_v19  ;;  %v802_v51 = vsel %vm405_vm3, %v801_v47, %v800_v44  ;;  %v683_v19 = vrot.slane %v674_v11, %v1592_v3 }
 0x16b   : > { %621 = vmatprep.subr.mxu0 %v570_v20 }
 0x16c   : > { %622 = vmatpush1.msra.mxu0 %v569_v21  ;;  %v581_v25 = vpop.permute.xlu0 %580  ;;  %v776_v21 = vcombine.low %v762_v9, %v766_v10 }
 0x16d   : > { %623 = vmatprep.subr.mxu0 %v568_v22 }
 0x16e   : > { %624 = vmatpush1.msra.mxu0 %v567_v24 }
 0x16f   : > { %1161 = vmatmul.mubr.msk.f32.vlgmr.msra.gmra.mxu0 %vm583_vm9, %v566_v23  ;;  %v1162_v23 = vld [vmem:[%s1855_s5 + $0x2] sm:$0x3] }
 0x170   : > { %v869_v30 = vpop.permute.xlu0 %868  ;;  %v712_v37 = vrot.slane %v1162_v23, %v1592_v3 }
 0x171   : > { %v870_v38 = vrot.slane %v869_v30, 4 }
 0x173   : > { %v871_v42 = vsel %vm347_vm0, %v870_v38, %v869_v30 }
 0x22f   : > { %v659_v26 = vpop.f32.mrf.mxu0 }
 0x230   : > { %v660_v27 = vadd.f32 %v659_v26, %v581_v25 }
 0x231   : > { %v661_v28 = vpop.f32.mrf.mxu0 }
 0x232   : > { %v662_v31 = vadd.f32 %v661_v28, %v581_v25  ;;  %v664_v32 = vmax.f32 %v660_v27, 0.0 }
 0x234   : > { %v665_v33 = vmax.f32 %v662_v31, 0.0  ;;  %v695_v31 = vcombine.low %v679_v18, %v683_v19 }
 0x236   : > { %v668_v34 = vcombine.low %v664_v32, %v665_v33  ;;  %v1179_v36 = vcombine.low %v665_v33, %v665_v33 }
 0x238   : > { %787 = vst [vmem:[#allocation3 + $0x28] sm:$0xf] %v1179_v36  ;;  %786 = vst [vmem:[#allocation3 + $0x48] sm:$0xf] %v668_v34  ;;  %742 = vrot.lane.b32.xlu1 %v668_v34, %s1414_s30  ;;  %740 = vrot.lane.b32.xlu0 %v668_v34, %s1414_s30  ;;  %v910_v40 = vmul.f32 %v905_v29, %v668_v34  ;;  %v909_v43 = vmul.f32 %v906_v39, %v668_v34  ;;  %s1036_s30 = scalar_lea.sflag [#allocation6], %s1576_s17 }
 0x239   : > { %v874_v45 = vmul.f32 %v871_v42, %v668_v34  ;;  %v841_v48 = vmul.f32 %v836_v41, %v668_v34  ;;  %v840_v49 = vmul.f32 %v837_v46, %v668_v34  ;;  %v875_v50 = vmul.f32 %v870_v38, %v668_v34 }
 0x23a   : > { %v913_v52 = vcombine.high %v909_v43, %v909_v43  ;;  %v805_v53 = vmul.f32 %v802_v51, %v668_v34  ;;  %v806_v56 = vmul.f32 %v801_v47, %v668_v34  ;;  %v708_v36 = vrot.slane %v1162_v23, %v1590_v2 }
 0x23b   : > { %v879_v54 = vcombine.low %v875_v50, %v875_v50  ;;  %v844_v55 = vcombine.high %v840_v49, %v840_v49  ;;  %v878_v57 = vcombine.low %v874_v45, %v874_v45 }
 0x23c   : > { %769 = vrot.lane.b32.xlu1 %v668_v34, %s1415_s12  ;;  %767 = vrot.lane.b32.xlu0 %v668_v34, %s1415_s12  ;;  %v809_v58 = vcombine.low %v805_v53, %v805_v53  ;;  %v810_v59 = vcombine.low %v806_v56, %v806_v56  ;;  %v722_v42 = vcombine.low %v708_v36, %v712_v37  ;;  %s1339_s12 = scalar_lea.vmem %s1051_s14, 128 }
 0x23d   : > { %p1340_p13 = scmp.ne.s32.totalorder %s1051_s14, %s1339_s12 }
 0x23f   : > { %p1341_p1 = pnand %p1340_p13, %p1879_p0 }
 0x240   : > { %688 = vrot.lane.b32.xlu1 %v668_v34, %s1412_s7  ;;  %686 = vrot.lane.b32.xlu0 %v668_v34, %s1412_s7 }
 0x241   : > { %p1342_p2 = pneg %p1341_p1 }
 0x244   : > { %713 = vrot.lane.b32.xlu1 %v668_v34, %s1413_s13  ;;  %715 = vrot.lane.b32.xlu0 %v668_v34, %s1413_s13  ;;  %s1048_s13 = scalar_lea.hbm %s1856_s6, %s1178_s10 }
 0x248   : > { %918 = vrot.lane.b32.xlu1 %v910_v40, %s1416_s29  ;;  %914 = vrot.lane.b32.xlu0 %v909_v43, %s1416_s29 }
 0x24c   : > { %882 = vrot.lane.b32.xlu1 %v874_v45, %s1417_s15  ;;  %849 = vrot.lane.b32.xlu0 %v841_v48, %s1418_s27 }
 0x250   : > { %845 = vrot.lane.b32.xlu1 %v840_v49, %s1418_s27  ;;  %916 = vrot.lane.b32.xlu0 %v913_v52, %s1416_s29  ;;  %s1422_s29 = smov [#allocation10]  }
 0x251   : > { %s1343_s25 = sshll.u32 %s1422_s29, 4  ;;  %s1344_s25 = int_to_ptr.vmem [resolvable:$false] %s1343_s25 }
 0x252   : > { %p1346_p4 = scmp.lt.s32.totalorder %s1051_s14, %s1344_s25 }
 0x254   : > { %813 = vrot.lane.b32.xlu1 %v805_v53, %s1877_s18  ;;  %884 = vrot.lane.b32.xlu0 %v879_v54, %s1417_s15 }
 0x258   : > { %847 = vrot.lane.b32.xlu1 %v844_v55, %s1418_s27  ;;  %880 = vrot.lane.b32.xlu0 %v878_v57, %s1417_s15  ;;  %s1345_s15 = scalar_lea.vmem %s1344_s25, 256 }
 0x259   : > { %p1347_p6 = scmp.lt.s32.totalorder %s1345_s15, %s1339_s12 }
 0x25b   : > { %p1348_p8 = por %p1347_p6, %p1346_p4 }
 0x25c   : > { %811 = vrot.lane.b32.xlu1 %v809_v58, %s1877_s18  ;;  %815 = vrot.lane.b32.xlu0 %v810_v59, %s1877_s18 }
 0x25d   : > { %p1349_p12 = pnand %p1348_p8, %p1342_p2 }
 0x260   : > { %940 = vperm.xlu0 %1257, %v937_v60  }
 0x2aa   : > { %v743_v1 = vpop.permute.xlu1 %742  ;;  %v741_v6 = vpop.permute.xlu0 %740 }
 0x2ab   : > { %v745_v5 = vrot.slane %v743_v1, 4  ;;  %v744_v8 = vrot.slane %v741_v6, 4 }
 0x2ad   : > { %v746_v13 = vsel %vm316_vm4, %v744_v8, %v745_v5 }
 0x2ae   : > { %v770_v14 = vpop.permute.xlu1 %769  ;;  %v747_v15 = vsel %vm376_vm2, %v746_v13, %v743_v1  ;;  %v768_v17 = vpop.permute.xlu0 %767 }
 0x2af   : > { %v772_v16 = vrot.slane %v770_v14, 4  ;;  %v751_v20 = vmul.f32 %v749_v7, %v747_v15  ;;  %v771_v22 = vrot.slane %v768_v17, 4 }
 0x2b1   : > { %v753_v24 = vcombine.high %v751_v20, %v751_v20  ;;  %755 = vst [vmem:[#allocation3 + $0x18] sm:$0xf] %v751_v20  ;;  %v773_v25 = vsel %vm316_vm4, %v771_v22, %v772_v16  ;;  %v926_v16 = vld [vmem:[#allocation9] sm:$0xf] }
 0x2b2   : > { %v689_v26 = vpop.permute.xlu1 %688  ;;  %v774_v27 = vsel %vm405_vm3, %v773_v25, %v770_v14  ;;  %v687_v32 = vpop.permute.xlu0 %686 }
 0x2b3   : > { %v691_v28 = vrot.slane %v689_v26, 4  ;;  %756 = vst [vmem:[#allocation3 + $0x10] sm:$0xf] %v753_v24  ;;  %v778_v33 = vmul.f32 %v776_v21, %v774_v27  ;;  %v690_v34 = vrot.slane %v687_v32, 4 }
 0x2b5   : > { %v780_v29 = vcombine.low %v778_v33, %v778_v33  ;;  %783 = vst [vmem:[#allocation3 + $0x10] sm:$0xf0] %v778_v33  ;;  %v692_v30 = vsel %vm316_vm4, %v690_v34, %v691_v28 }
 0x2b6   : > { %v714_v35 = vpop.permute.xlu1 %713  ;;  %v693_v38 = vsel %vm318_vm1, %v692_v30, %v689_v26  ;;  %v716_v40 = vpop.permute.xlu0 %715 }
 0x2b7   : > { %v717_v39 = vrot.slane %v714_v35, 4  ;;  %782 = vst [vmem:[#allocation3 + $0x18] sm:$0xf0] %v780_v29  ;;  %v697_v41 = vmul.f32 %v695_v31, %v693_v38  ;;  %v718_v43 = vrot.slane %v716_v40, 4 }
 0x2b9   : > { %v699_v44 = vcombine.high %v697_v41, %v697_v41  ;;  %701 = vst [vmem:[#allocation3 + $0x30] sm:$0xf] %v697_v41  ;;  %v719_v45 = vsel %vm316_vm4, %v717_v39, %v718_v43 }
 0x2ba   : > { %v919_v2 = vpop.permute.xlu1 %918  ;;  %v720_v3 = vsel %vm347_vm0, %v719_v45, %v716_v40  ;;  %v915_v46 = vpop.permute.xlu0 %914 }
 0x2bb   : > { %702 = vst [vmem:[#allocation3] sm:$0xf] %v699_v44  ;;  %v724_v47 = vmul.f32 %v722_v42, %v720_v3 }
 0x2bc   : > { %v930_v13 = vld [vmem:[#allocation3 + $0x10] sm:$0xff] }
 0x2bd   : > { %v726_v48 = vcombine.low %v724_v47, %v724_v47  ;;  %729 = vst [vmem:[#allocation3] sm:$0xf0] %v724_v47 }
 0x2be   : > { %v883_v49 = vpop.permute.xlu1 %882  ;;  %v850_v50 = vpop.permute.xlu0 %849  ;;  %v929_v14 = vld [vmem:[#allocation3 + $0x18] sm:$0xff] }
 0x2bf   : > { %728 = vst [vmem:[#allocation3 + $0x30] sm:$0xf0] %v726_v48 }
 0x2c2   : > { %v846_v51 = vpop.permute.xlu1 %845  ;;  %v917_v52 = vpop.permute.xlu0 %916 }
 0x2c3   : > { %v920_v53 = vsel %vm559_vm6, %v915_v46, %v917_v52  ;;  %v921_v54 = vsel %vm559_vm6, %v917_v52, %v919_v2 }
 0x2c4   : > { %924 = vst [vmem:[#allocation3 + $0x40] sm:$0xf] %v920_v53  ;;  %925 = vst [vmem:[#allocation3 + $0x38] sm:$0xf] %v921_v54  ;;  %v928_v15 = vld [vmem:[#allocation3] sm:$0xff] }
 0x2c6   : > { %v814_v55 = vpop.permute.xlu1 %813  ;;  %v885_v56 = vpop.permute.xlu0 %884  ;;  %v927_v17 = vld [vmem:[#allocation3 + $0x30] sm:$0xff] }
 0x2c7   : > { %v887_v57 = vsel %vm523_vm5, %v883_v49, %v885_v56 }
 0x2c8   : > { %891 = vst [vmem:[#allocation3 + $0x20] sm:$0xf0] %v887_v57 }
 0x2ca   : > { %v848_v58 = vpop.permute.xlu1 %847  ;;  %v881_v59 = vpop.permute.xlu0 %880 }
 0x2cb   : > { %v851_v60 = vsel %vm486_vm7, %v846_v51, %v848_v58  ;;  %v852_v61 = vsel %vm486_vm7, %v848_v58, %v850_v50  ;;  %v886_v62 = vsel %vm523_vm5, %v881_v59, %v883_v49  ;;  %v936_v63 = vld [vmem:[#allocation3 + $0x38] sm:$0xf]  ;;  %v935_v0 = vld [vmem:[#allocation3 + $0x40] sm:$0xf] }
 0x2cc   : > { %855 = vst [vmem:[#allocation3 + $0x8] sm:$0xf] %v851_v60  ;;  %856 = vst [vmem:[#allocation3 + $0x20] sm:$0xf] %v852_v61  ;;  %1169 = vmatprep.subr.msk.mxu1 %vm316_vm4, %v936_v63 }
 0x2cd   : > { %890 = vst [vmem:[#allocation3 + $0x8] sm:$0xf0] %v886_v62  ;;  %1170 = vmatpush1.msk.msra.mxu1 %vm316_vm4, %v935_v0 }
 0x2ce   : > { %v812_v1 = vpop.permute.xlu1 %811  ;;  %v816_v5 = vpop.permute.xlu0 %815 }
 0x2cf   : > { %v817_v6 = vsel %vm450_vm8, %v812_v1, %v814_v55  ;;  %v818_v7 = vsel %vm450_vm8, %v814_v55, %v816_v5 }
 0x2d0   : > { %821 = vst [vmem:[#allocation3 + $0x48] sm:$0xf0] %v817_v6  ;;  %822 = vst [vmem:[#allocation3 + $0x28] sm:$0xf0] %v818_v7 }
 0x2d3   : > { %v934_v8 = vld [vmem:[#allocation3 + $0x20] sm:$0xff] }
 0x2d4   : > { %976 = vmatprep.subr.mxu1 %v934_v8  ;;  %v933_v9 = vld [vmem:[#allocation3 + $0x8] sm:$0xff] }
 0x2d5   : > { %977 = vmatpush1.msra.mxu1 %v933_v9 }
 0x2d7   : > { %v931_v10 = vld [vmem:[#allocation3 + $0x48] sm:$0xff] }
 0x2d8   : > { %v932_v11 = vld [vmem:[#allocation3 + $0x28] sm:$0xff] }
 0x2d9   : > { %978 = vmatprep.subr.mxu1 %v932_v11 }
 0x2da   : > { %979 = vmatpush1.msra.mxu1 %v931_v10 }
 0x2db   : > { %980 = vmatprep.subr.mxu1 %v930_v13  ;;  %v941_v18 = vpop.permute.xlu0 %940 }
 0x2dc   : > { %981 = vmatpush1.msra.mxu1 %v929_v14 }
 0x2dd   : > { %982 = vmatprep.subr.mxu1 %v928_v15 }
 0x2de   : > { %983 = vmatpush1.msra.mxu1 %v927_v17 }
 0x2df   : > { %1171 = vmatmul.mubr.msk.f32.vlgmr.msra.gmra.mxu1 %vm583_vm9, %v926_v16 }
 0x39f   : > { %v1018_v19 = vpop.f32.mrf.mxu1 }
 0x3a0   : > { %v1019_v20 = vadd.f32 %v1018_v19, %v941_v18 }
 0x3a1   : > { %v1020_v21 = vpop.f32.mrf.mxu1 }
 0x3a2   : > { %v1026_v22 = vadd.f32 %v1019_v20, %v1610_v12  ;;  %v1021_v23 = vadd.f32 %v1020_v21, %v941_v18 }
 0x3a4   : > { %v1027_v24 = vadd.f32 %v1021_v23, %v1685_v4  ;;  %v1028_v25 = vmax.f32 %v1026_v22, 0.0 }
 0x3a6   : > { %v1029_v26 = vmax.f32 %v1027_v24, 0.0 }
 0x3a8   : > { %v1032_v27 = vcombine.low %v1028_v25, %v1029_v26 }
 0x3aa   : > { %1034 = vst [vmem:[%s292_s9] sm:$0xff] %v1032_v27 }
 0x3ab   : > { %1352 = shalt.err (!%p1349_p12)
}
 0x3ac   : > { %s1353_s27 = scalar_lea.hbm %s1048_s13, 128  ;;  %s1357_s16 = scalar_lea.hbm %s1856_s6, 256 }
 0x3ad   : > { %p1354_p3 = scmp.ne.s32.totalorder %s1048_s13, %s1353_s27  ;;  %p1358_p5 = scmp.lt.s32.totalorder %s1048_s13, %s1856_s6 }
 0x3ae   : > { %p1359_p9 = scmp.lt.s32.totalorder %s1357_s16, %s1353_s27 }
 0x3af   : > { %p1355_p7 = pnand %p1354_p3, %p1879_p0 }
 0x3b0   : > { %p1360_p11 = por %p1359_p9, %p1358_p5 }
 0x3b1   : > { %p1356_p10 = pneg %p1355_p7 }
 0x3b3   : > { %p1361_p13 = pnand %p1360_p11, %p1356_p10 }
 0x3b5   : > { %1364 = shalt.err (!%p1361_p13)
}
 0x3b6   : > { %1190 = dma.vmem_to_hbm [thread:$0]  (%p1879_p0), %s1051_s14, 128, %s1048_s13, %s1036_s30  }
 0x3b7 PF: > { %s1062_s19 = sand.u32 1, %s1395_s21   ;;  %p1880_p1 = scmp.ne.s32.totalorder %s1866_s28, 0 }
 0x3b8   : > { %p1881_p2 = scmp.ge.s32.totalorder %s1407_s24, 2  ;;  %s1063_s9 = scalar_lea.sflag [#allocation6], %s1062_s19 }
 0x3ba   : > { %p1204_p4 = pnand %p1881_p2, %p1880_p1 }
 0x3bc   : > { %p1205_p6 = pneg %p1204_p4 }
 0x3be   : > { %1390 = dma.done.wait (%p1205_p6), %s1063_s9, 128  }
 0x3bf   : > { %1392 = vsyncadd (%p1205_p6), %s1063_s9, 4294967168  ;;  %p20_p8 = scmp.ge.s32.totalorder %s1512_s11, 4   ;;  %s1882_s21 = smov %s1399_s22 }
 0x3c0   : > { %s1883_s22 = smov %s1403_s23  ;;  %s1884_s23 = smov %s1539_s20 }
 0x3c1   : > { %s1885_s24 = smov %s1512_s11  ;;  %22 = sbr.rel (!%p20_p8) target bundleno = 8 (0x8), region = 104 }
 0x3c6   :  { %1068 = vsyncpa [#allocation5], 1 }
 0x3c7   :  { %1070 = vsyncpa [#allocation5 + $0x1], 1 }
 0x3c8   :  { %1071 = vsyncpa [#allocation8], 1 }
 0x3c9   :  { %1072 = vsyncpa [#allocation6], 1 }
 0x3ca   :  { %1074 = vsyncpa [#allocation6 + $0x1], 1 }

</bundles_post_ra>
